<compile_context>
chip_gen: v5e
topology: v5e:2x2
jax: 0.10.0
libtpu: 0.0.40
codegen_flags: <defaults>
</compile_context>

<pallas_src>
from typing import List, Optional

import numpy as np
import jax
import jax.numpy as jnp
from jax.experimental import pallas as pl
from jax.experimental.pallas import tpu as pltpu

OBJECTS = ['box', 'ketchup', 'laptop', 'phone']  # small synthetic subset


# ----------------------------------------------------------------------------
# Glue: pytorch3d-style axis_angle -> quaternion (w, x, y, z) and composition
# ----------------------------------------------------------------------------
def axis_angle_to_quaternion(axis_angle: jnp.ndarray) -> jnp.ndarray:
    angles = jnp.linalg.norm(axis_angle, axis=-1, keepdims=True)
    half = angles * 0.5
    eps = 1e-6
    small = jnp.abs(angles) < eps
    safe_angles = jnp.where(small, jnp.ones_like(angles), angles)
    sin_half_over_angle = jnp.where(
        small, 0.5 - angles * angles / 48.0, jnp.sin(half) / safe_angles)
    return jnp.concatenate([jnp.cos(half), axis_angle * sin_half_over_angle],
                           axis=-1)


def quaternion_multiply(a: jnp.ndarray, b: jnp.ndarray) -> jnp.ndarray:
    """Hamilton product a (x) b, (w,x,y,z) convention. Rotation(a(x)b)=R(a)R(b)."""
    aw, ax, ay, az = a[..., 0], a[..., 1], a[..., 2], a[..., 3]
    bw, bx, by, bz = b[..., 0], b[..., 1], b[..., 2], b[..., 3]
    return jnp.stack([
        aw * bw - ax * bx - ay * by - az * bz,
        aw * bx + ax * bw + ay * bz - az * by,
        aw * by - ax * bz + ay * bw + az * bx,
        aw * bz + ax * by - ay * bx + az * bw,
    ], axis=-1)


# ----------------------------------------------------------------------------
# Pallas kernel: per-lane quaternion select -> single rotation -> translate
# ----------------------------------------------------------------------------
def _obj_transform_kernel(qt_ref, qg_ref, tr_ref,          # (BB,4) (BB,4) (BB,3)
                          px_ref, py_ref, pz_ref, m_ref,   # (BB,NT) component planes
                          ox_ref, oy_ref, oz_ref):         # (BB,NT) outputs
    qt = qt_ref[...]                 # composed quaternion q_global (x) q_arti
    qg = qg_ref[...]                 # global-orientation quaternion
    tr = tr_ref[...]
    sel = m_ref[...] > 0.5           # (BB, NT) — True for "top" vertices

    # Per-lane quaternion selection: top lanes use the composed quaternion,
    # bottom lanes use the global one.  Both are unit quaternions, so a single
    # rotation per point is exact.  (B,1) columns broadcast along the lane axis.
    w = jnp.where(sel, qt[:, 0:1], qg[:, 0:1])
    x = jnp.where(sel, qt[:, 1:2], qg[:, 1:2])
    y = jnp.where(sel, qt[:, 2:3], qg[:, 2:3])
    z = jnp.where(sel, qt[:, 3:4], qg[:, 3:4])

    px = px_ref[...]
    py = py_ref[...]
    pz = pz_ref[...]

    # unit-quaternion rotation:  p' = p + 2*(w*(u x p) + u x (u x p))
    cx = y * pz - z * py
    cy = z * px - x * pz
    cz = x * py - y * px
    ccx = y * cz - z * cy
    ccy = z * cx - x * cz
    ccz = x * cy - y * cx

    # direct per-component stores (no sublane concat)
    ox_ref[...] = px + 2.0 * (w * cx + ccx) + tr[:, 0:1]
    oy_ref[...] = py + 2.0 * (w * cy + ccy) + tr[:, 1:2]
    oz_ref[...] = pz + 2.0 * (w * cz + ccz) + tr[:, 2:3]


def _batch_block(B: int) -> int:
    # Full-sublane blocks of 8 when possible (and >1 grid step -> v7x can shard
    # the parallel axis across its two TensorCores); otherwise one block.
    if B > 8 and B % 8 == 0:
        return 8
    return B


def object_transform(q_top, q_global, transl, px, py, pz, top_mask):
    """Apply the articulated rigid transform to lane-dense component planes."""
    B, NT = px.shape  # NT is a multiple of 128 by construction -> unmasked vst
    BB = _batch_block(B)
    grid = (B // BB,)

    def small_spec(last):
        return pl.BlockSpec((BB, last), lambda i: (i, 0))

    pspec = pl.BlockSpec((BB, NT), lambda i: (i, 0))
    out_shape = jax.ShapeDtypeStruct((B, NT), jnp.float32)

    return pl.pallas_call(
        _obj_transform_kernel,
        out_shape=(out_shape, out_shape, out_shape),
        grid_spec=pltpu.PrefetchScalarGridSpec(
            num_scalar_prefetch=0,
            grid=grid,
            in_specs=[small_spec(4), small_spec(4), small_spec(3),
                      pspec, pspec, pspec, pspec],
            out_specs=[pspec, pspec, pspec]),
        compiler_params=pltpu.CompilerParams(
            dimension_semantics=("parallel",)),
    )(q_top.astype(jnp.float32), q_global.astype(jnp.float32),
      transl.astype(jnp.float32),
      px.astype(jnp.float32), py.astype(jnp.float32), pz.astype(jnp.float32),
      top_mask.astype(jnp.float32))


# ----------------------------------------------------------------------------
# ObjectTensors module (synthetic, deterministic "object_vtemplates")
# ----------------------------------------------------------------------------
class ObjectTensors:
    def __init__(self, key, objects_list: Optional[List[str]] = None,
                 max_v: int = 256, n_sub: int = 128, n_faces: int = 128):
        if objects_list is None:
            objects_list = OBJECTS
        n_obj = len(objects_list)
        ks = jax.random.split(key, 8)

        base_lens = [max_v, max_v - 64, max_v - 32, max_v - 96]
        v_len = np.array((base_lens * ((n_obj + 3) // 4))[:n_obj], dtype=np.int32)
        valid = (np.arange(max_v)[None, :] < v_len[:, None]).astype(np.float32)

        v = jax.random.normal(ks[0], (n_obj, max_v, 3), jnp.float32) * 0.1
        v = v * jnp.asarray(valid)[..., None]                       # pad -> 0
        parts = jax.random.bernoulli(ks[1], 0.5, (n_obj, max_v)).astype(jnp.int32) + 1
        parts_ids = parts * jnp.asarray(valid, jnp.int32)           # pad -> 0

        v_sub = jax.random.normal(ks[2], (n_obj, n_sub, 3), jnp.float32) * 0.1
        parts_sub_ids = (jax.random.bernoulli(ks[3], 0.5, (n_obj, n_sub))
                         .astype(jnp.int32) + 1)

        diameter = jax.random.uniform(ks[4], (n_obj,), jnp.float32, 0.1, 0.4)
        faces = jax.random.randint(ks[5], (n_obj, n_faces, 3), 0, max_v)
        f_len = jnp.full((n_obj,), n_faces, jnp.int32)

        # --- pre-transposed, lane-dense kernel layout (paid once at init) ---
        # full-res and sub-sampled clouds concatenated along the lane axis:
        # NT = max_v + n_sub (multiple of 128).
        pts = jnp.concatenate([v, v_sub], axis=1)                   # (n_obj, NT, 3)
        top_mask = jnp.concatenate(
            [(parts_ids == 1), (parts_sub_ids == 1)], axis=1).astype(jnp.float32)

        self.max_v = max_v
        self.n_sub = n_sub

        self.obj_tensors = {
            'names': objects_list,
            'v': v, 'v_len': jnp.asarray(v_len), 'v_len_np': v_len,
            'v_sub': v_sub,
            'parts_ids': parts_ids, 'parts_sub_ids': parts_sub_ids,
            'mask': jnp.asarray(valid),
            'f': faces, 'f_len': f_len,
            'diameter': diameter,
            'z_axis': jnp.array([[0.0, 0.0, -1.0]], jnp.float32),
            # lane-dense per-component planes for the kernel
            'pts_x': pts[..., 0], 'pts_y': pts[..., 1], 'pts_z': pts[..., 2],
            'top_mask': top_mask,
        }

    def forward(self, angles, global_orient, transl, query_names):
        ot = self.obj_tensors
        obj_idx = np.array([ot['names'].index(n) for n in query_names])
        out = {}
        out['diameter'] = ot['diameter'][obj_idx]
        out['f'] = ot['f'][obj_idx]
        out['f_len'] = ot['f_len'][obj_idx]
        out['v_len'] = ot['v_len'][obj_idx]
        max_len = int(ot['v_len_np'][obj_idx].max())
        out['mask'] = ot['mask'][obj_idx][:, :max_len]
        out['parts_ids'] = ot['parts_ids'][obj_idx][:, :max_len]
        out['parts_sub_ids'] = ot['parts_sub_ids'][obj_idx]

        # quaternions (glue): compose articulation + global once per batch item
        quat_arti = axis_angle_to_quaternion(ot['z_axis'] * angles)         # (B,4)
        quat_global = axis_angle_to_quaternion(global_orient.reshape(-1, 3))
        quat_top = quaternion_multiply(quat_global, quat_arti)              # (B,4)
        if transl is None:
            transl = jnp.zeros((quat_arti.shape[0], 3), jnp.float32)

        # gather pre-transposed templates (constants -> no per-call transpose)
        px = ot['pts_x'][obj_idx]                                           # (B, NT)
        py = ot['pts_y'][obj_idx]
        pz = ot['pts_z'][obj_idx]
        tm = ot['top_mask'][obj_idx]

        ox, oy, oz = object_transform(quat_top, quat_global, transl, px, py, pz, tm)

        mv = self.max_v
        out['v'] = jnp.stack(
            [ox[:, :max_len], oy[:, :max_len], oz[:, :max_len]], axis=-1)
        out['v_sub'] = jnp.stack([ox[:, mv:], oy[:, mv:], oz[:, mv:]], axis=-1)
        # TODO(synk): bbox/kp3d are computed in the reference but never added to
        # the output dict (dead code), so they are omitted here.
        return out


# ----------------------------------------------------------------------------
# Pure-JAX reference for verification (uncomposed / sequential rotations)
# ----------------------------------------------------------------------------
def _ref_quaternion_apply(q, p):  # q (B,4) unit, p (B,N,3)
    w = q[:, None, 0:1]
    u = jnp.broadcast_to(q[:, None, 1:4], p.shape)
    c = jnp.cross(u, p)
    cc = jnp.cross(u, c)
    return p + 2.0 * (w * c + cc)


def _reference_forward(v, parts_ids, quat_arti, quat_global, transl):
    top = _ref_quaternion_apply(quat_global, _ref_quaternion_apply(quat_arti, v))
    bot = _ref_quaternion_apply(quat_global, v)
    top = top + transl[:, None, :]
    bot = bot + transl[:, None, :]
    sel = (parts_ids == 1)[..., None]
    return jnp.where(sel, top, bot)


if __name__ == "__main__":
    key = jax.random.PRNGKey(0)
    k_init, k_a, k_g, k_t = jax.random.split(key, 4)

    obj_module = ObjectTensors(k_init)

    B = 2
    query_names = ['laptop', 'box']
    angles = jax.random.uniform(k_a, (B, 1), jnp.float32, -0.6, 0.6)
    global_orient = jax.random.normal(k_g, (B, 3), jnp.float32) * 0.3
    transl = jax.random.normal(k_t, (B, 3), jnp.float32) * 0.1

    out = obj_module.forward(angles, global_orient, transl, query_names)
    jax.block_until_ready(out['v'])
    jax.block_until_ready(out['v_sub'])

    # correctness check against a pure-JAX reference (sequential rotations)
    ot = obj_module.obj_tensors
    obj_idx = np.array([ot['names'].index(n) for n in query_names])
    qa = axis_angle_to_quaternion(ot['z_axis'] * angles)
    qg = axis_angle_to_quaternion(global_orient.reshape(-1, 3))
    max_len = int(ot['v_len_np'][obj_idx].max())
    v_ref = _reference_forward(ot['v'][obj_idx], ot['parts_ids'][obj_idx],
                               qa, qg, transl)[:, :max_len]
    vsub_ref = _reference_forward(ot['v_sub'][obj_idx], ot['parts_sub_ids'][obj_idx],
                                  qa, qg, transl)

    assert np.allclose(np.asarray(out['v']), np.asarray(v_ref), atol=1e-4, rtol=1e-4)
    assert np.allclose(np.asarray(out['v_sub']), np.asarray(vsub_ref),
                       atol=1e-4, rtol=1e-4)
    assert out['v'].shape == (B, max_len, 3)
    assert out['v_sub'].shape == (B, 128, 3)

    print("KERNEL_OK")
</pallas_src>

<mosaic_0001>
module attributes {stable_mosaic.version = 11 : i64} {
  func.func @_obj_transform_kernel(%arg0: i32, %arg1: memref<2x4xf32, #tpu.memory_space<vmem>>, %arg2: memref<2x4xf32, #tpu.memory_space<vmem>>, %arg3: memref<2x3xf32, #tpu.memory_space<vmem>>, %arg4: memref<2x384xf32, #tpu.memory_space<vmem>>, %arg5: memref<2x384xf32, #tpu.memory_space<vmem>>, %arg6: memref<2x384xf32, #tpu.memory_space<vmem>>, %arg7: memref<2x384xf32, #tpu.memory_space<vmem>>, %arg8: memref<2x384xf32, #tpu.memory_space<vmem>>, %arg9: memref<2x384xf32, #tpu.memory_space<vmem>>, %arg10: memref<2x384xf32, #tpu.memory_space<vmem>>) attributes {dimension_semantics = [#tpu.dimension_semantics<parallel>], iteration_bounds = array<i64: 1>, scalar_prefetch = 0 : i64, scratch_operands = 0 : i64, tpu.core_type = #tpu.core_type<tc>, window_params = [{transform_indices = @transform_0, window_bounds = array<i64: 2, 4>}, {transform_indices = @transform_1, window_bounds = array<i64: 2, 4>}, {transform_indices = @transform_2, window_bounds = array<i64: 2, 3>}, {transform_indices = @transform_3, window_bounds = array<i64: 2, 384>}, {transform_indices = @transform_4, window_bounds = array<i64: 2, 384>}, {transform_indices = @transform_5, window_bounds = array<i64: 2, 384>}, {transform_indices = @transform_6, window_bounds = array<i64: 2, 384>}, {transform_indices = @transform_7, window_bounds = array<i64: 2, 384>}, {transform_indices = @transform_8, window_bounds = array<i64: 2, 384>}, {transform_indices = @transform_9, window_bounds = array<i64: 2, 384>}]} {
    %c0 = arith.constant 0 : index
    %c0_0 = arith.constant 0 : index
    %0 = vector.load %arg1[%c0, %c0_0] : memref<2x4xf32, #tpu.memory_space<vmem>>, vector<2x4xf32>
    %c0_1 = arith.constant 0 : index
    %c0_2 = arith.constant 0 : index
    %1 = vector.load %arg2[%c0_1, %c0_2] : memref<2x4xf32, #tpu.memory_space<vmem>>, vector<2x4xf32>
    %c0_3 = arith.constant 0 : index
    %c0_4 = arith.constant 0 : index
    %2 = vector.load %arg3[%c0_3, %c0_4] : memref<2x3xf32, #tpu.memory_space<vmem>>, vector<2x3xf32>
    %c0_5 = arith.constant 0 : index
    %c0_6 = arith.constant 0 : index
    %3 = vector.load %arg7[%c0_5, %c0_6] : memref<2x384xf32, #tpu.memory_space<vmem>>, vector<2x384xf32>
    %cst = arith.constant 5.000000e-01 : f32
    %4 = vector.broadcast %cst : f32 to vector<2x384xf32>
    %5 = arith.cmpf ogt, %3, %4 : vector<2x384xf32>
    %6 = vector.extract_strided_slice %0 {offsets = [0, 0], sizes = [2, 1], strides = [1, 1]} : vector<2x4xf32> to vector<2x1xf32>
    %7 = vector.extract_strided_slice %1 {offsets = [0, 0], sizes = [2, 1], strides = [1, 1]} : vector<2x4xf32> to vector<2x1xf32>
    %8 = vector.shape_cast %6 : vector<2x1xf32> to vector<2x1xf32>
    %9 = vector.broadcast %8 : vector<2x1xf32> to vector<2x384xf32>
    %10 = vector.shape_cast %7 : vector<2x1xf32> to vector<2x1xf32>
    %11 = vector.broadcast %10 : vector<2x1xf32> to vector<2x384xf32>
    %12 = arith.select %5, %9, %11 : vector<2x384xi1>, vector<2x384xf32>
    %13 = vector.extract_strided_slice %0 {offsets = [0, 1], sizes = [2, 1], strides = [1, 1]} : vector<2x4xf32> to vector<2x1xf32>
    %14 = vector.extract_strided_slice %1 {offsets = [0, 1], sizes = [2, 1], strides = [1, 1]} : vector<2x4xf32> to vector<2x1xf32>
    %15 = vector.shape_cast %13 : vector<2x1xf32> to vector<2x1xf32>
    %16 = vector.broadcast %15 : vector<2x1xf32> to vector<2x384xf32>
    %17 = vector.shape_cast %14 : vector<2x1xf32> to vector<2x1xf32>
    %18 = vector.broadcast %17 : vector<2x1xf32> to vector<2x384xf32>
    %19 = arith.select %5, %16, %18 : vector<2x384xi1>, vector<2x384xf32>
    %20 = vector.extract_strided_slice %0 {offsets = [0, 2], sizes = [2, 1], strides = [1, 1]} : vector<2x4xf32> to vector<2x1xf32>
    %21 = vector.extract_strided_slice %1 {offsets = [0, 2], sizes = [2, 1], strides = [1, 1]} : vector<2x4xf32> to vector<2x1xf32>
    %22 = vector.shape_cast %20 : vector<2x1xf32> to vector<2x1xf32>
    %23 = vector.broadcast %22 : vector<2x1xf32> to vector<2x384xf32>
    %24 = vector.shape_cast %21 : vector<2x1xf32> to vector<2x1xf32>
    %25 = vector.broadcast %24 : vector<2x1xf32> to vector<2x384xf32>
    %26 = arith.select %5, %23, %25 : vector<2x384xi1>, vector<2x384xf32>
    %27 = vector.extract_strided_slice %0 {offsets = [0, 3], sizes = [2, 1], strides = [1, 1]} : vector<2x4xf32> to vector<2x1xf32>
    %28 = vector.extract_strided_slice %1 {offsets = [0, 3], sizes = [2, 1], strides = [1, 1]} : vector<2x4xf32> to vector<2x1xf32>
    %29 = vector.shape_cast %27 : vector<2x1xf32> to vector<2x1xf32>
    %30 = vector.broadcast %29 : vector<2x1xf32> to vector<2x384xf32>
    %31 = vector.shape_cast %28 : vector<2x1xf32> to vector<2x1xf32>
    %32 = vector.broadcast %31 : vector<2x1xf32> to vector<2x384xf32>
    %33 = arith.select %5, %30, %32 : vector<2x384xi1>, vector<2x384xf32>
    %c0_7 = arith.constant 0 : index
    %c0_8 = arith.constant 0 : index
    %34 = vector.load %arg4[%c0_7, %c0_8] : memref<2x384xf32, #tpu.memory_space<vmem>>, vector<2x384xf32>
    %c0_9 = arith.constant 0 : index
    %c0_10 = arith.constant 0 : index
    %35 = vector.load %arg5[%c0_9, %c0_10] : memref<2x384xf32, #tpu.memory_space<vmem>>, vector<2x384xf32>
    %c0_11 = arith.constant 0 : index
    %c0_12 = arith.constant 0 : index
    %36 = vector.load %arg6[%c0_11, %c0_12] : memref<2x384xf32, #tpu.memory_space<vmem>>, vector<2x384xf32>
    %37 = arith.mulf %26, %36 : vector<2x384xf32>
    %38 = arith.mulf %33, %35 : vector<2x384xf32>
    %39 = arith.subf %37, %38 : vector<2x384xf32>
    %40 = arith.mulf %33, %34 : vector<2x384xf32>
    %41 = arith.mulf %19, %36 : vector<2x384xf32>
    %42 = arith.subf %40, %41 : vector<2x384xf32>
    %43 = arith.mulf %19, %35 : vector<2x384xf32>
    %44 = arith.mulf %26, %34 : vector<2x384xf32>
    %45 = arith.subf %43, %44 : vector<2x384xf32>
    %46 = arith.mulf %26, %45 : vector<2x384xf32>
    %47 = arith.mulf %33, %42 : vector<2x384xf32>
    %48 = arith.subf %46, %47 : vector<2x384xf32>
    %49 = arith.mulf %33, %39 : vector<2x384xf32>
    %50 = arith.mulf %19, %45 : vector<2x384xf32>
    %51 = arith.subf %49, %50 : vector<2x384xf32>
    %52 = arith.mulf %19, %42 : vector<2x384xf32>
    %53 = arith.mulf %26, %39 : vector<2x384xf32>
    %54 = arith.subf %52, %53 : vector<2x384xf32>
    %55 = arith.mulf %12, %39 : vector<2x384xf32>
    %56 = arith.addf %55, %48 : vector<2x384xf32>
    %cst_13 = arith.constant 2.000000e+00 : f32
    %57 = vector.broadcast %cst_13 : f32 to vector<2x384xf32>
    %58 = arith.mulf %57, %56 : vector<2x384xf32>
    %59 = arith.addf %34, %58 : vector<2x384xf32>
    %60 = vector.extract_strided_slice %2 {offsets = [0, 0], sizes = [2, 1], strides = [1, 1]} : vector<2x3xf32> to vector<2x1xf32>
    %61 = vector.broadcast %60 : vector<2x1xf32> to vector<2x384xf32>
    %62 = arith.addf %59, %61 : vector<2x384xf32>
    %c0_14 = arith.constant 0 : index
    %c0_15 = arith.constant 0 : index
    %63 = vector.load %arg8[%c0_14, %c0_15] : memref<2x384xf32, #tpu.memory_space<vmem>>, vector<2x384xf32>
    tpu.vector_store %arg8[%c0_14, %c0_15], %62 {strides = array<i32>} : memref<2x384xf32, #tpu.memory_space<vmem>>, vector<2x384xf32>,
    %64 = arith.mulf %12, %42 : vector<2x384xf32>
    %65 = arith.addf %64, %51 : vector<2x384xf32>
    %cst_16 = arith.constant 2.000000e+00 : f32
    %66 = vector.broadcast %cst_16 : f32 to vector<2x384xf32>
    %67 = arith.mulf %66, %65 : vector<2x384xf32>
    %68 = arith.addf %35, %67 : vector<2x384xf32>
    %69 = vector.extract_strided_slice %2 {offsets = [0, 1], sizes = [2, 1], strides = [1, 1]} : vector<2x3xf32> to vector<2x1xf32>
    %70 = vector.broadcast %69 : vector<2x1xf32> to vector<2x384xf32>
    %71 = arith.addf %68, %70 : vector<2x384xf32>
    %c0_17 = arith.constant 0 : index
    %c0_18 = arith.constant 0 : index
    %72 = vector.load %arg9[%c0_17, %c0_18] : memref<2x384xf32, #tpu.memory_space<vmem>>, vector<2x384xf32>
    tpu.vector_store %arg9[%c0_17, %c0_18], %71 {strides = array<i32>} : memref<2x384xf32, #tpu.memory_space<vmem>>, vector<2x384xf32>,
    %73 = arith.mulf %12, %45 : vector<2x384xf32>
    %74 = arith.addf %73, %54 : vector<2x384xf32>
    %cst_19 = arith.constant 2.000000e+00 : f32
    %75 = vector.broadcast %cst_19 : f32 to vector<2x384xf32>
    %76 = arith.mulf %75, %74 : vector<2x384xf32>
    %77 = arith.addf %36, %76 : vector<2x384xf32>
    %78 = vector.extract_strided_slice %2 {offsets = [0, 2], sizes = [2, 1], strides = [1, 1]} : vector<2x3xf32> to vector<2x1xf32>
    %79 = vector.broadcast %78 : vector<2x1xf32> to vector<2x384xf32>
    %80 = arith.addf %77, %79 : vector<2x384xf32>
    %c0_20 = arith.constant 0 : index
    %c0_21 = arith.constant 0 : index
    %81 = vector.load %arg10[%c0_20, %c0_21] : memref<2x384xf32, #tpu.memory_space<vmem>>, vector<2x384xf32>
    tpu.vector_store %arg10[%c0_20, %c0_21], %80 {strides = array<i32>} : memref<2x384xf32, #tpu.memory_space<vmem>>, vector<2x384xf32>,
    return
  }
  func.func @transform_0(%arg0: i32) -> (i32, i32) {
    %c0_i32 = arith.constant 0 : i32
    %c0_i32_0 = arith.constant 0 : i32
    return %arg0, %c0_i32 : i32, i32
  }
  func.func @transform_1(%arg0: i32) -> (i32, i32) {
    %c0_i32 = arith.constant 0 : i32
    %c0_i32_0 = arith.constant 0 : i32
    return %arg0, %c0_i32 : i32, i32
  }
  func.func @transform_2(%arg0: i32) -> (i32, i32) {
    %c0_i32 = arith.constant 0 : i32
    %c0_i32_0 = arith.constant 0 : i32
    return %arg0, %c0_i32 : i32, i32
  }
  func.func @transform_3(%arg0: i32) -> (i32, i32) {
    %c0_i32 = arith.constant 0 : i32
    %c0_i32_0 = arith.constant 0 : i32
    return %arg0, %c0_i32 : i32, i32
  }
  func.func @transform_4(%arg0: i32) -> (i32, i32) {
    %c0_i32 = arith.constant 0 : i32
    %c0_i32_0 = arith.constant 0 : i32
    return %arg0, %c0_i32 : i32, i32
  }
  func.func @transform_5(%arg0: i32) -> (i32, i32) {
    %c0_i32 = arith.constant 0 : i32
    %c0_i32_0 = arith.constant 0 : i32
    return %arg0, %c0_i32 : i32, i32
  }
  func.func @transform_6(%arg0: i32) -> (i32, i32) {
    %c0_i32 = arith.constant 0 : i32
    %c0_i32_0 = arith.constant 0 : i32
    return %arg0, %c0_i32 : i32, i32
  }
  func.func @transform_7(%arg0: i32) -> (i32, i32) {
    %c0_i32 = arith.constant 0 : i32
    %c0_i32_0 = arith.constant 0 : i32
    return %arg0, %c0_i32 : i32, i32
  }
  func.func @transform_8(%arg0: i32) -> (i32, i32) {
    %c0_i32 = arith.constant 0 : i32
    %c0_i32_0 = arith.constant 0 : i32
    return %arg0, %c0_i32 : i32, i32
  }
  func.func @transform_9(%arg0: i32) -> (i32, i32) {
    %c0_i32 = arith.constant 0 : i32
    %c0_i32_0 = arith.constant 0 : i32
    return %arg0, %c0_i32 : i32, i32
  }
}

</mosaic_0001>

<bundles_post_ra>
// kernel: tpu_custom_call.1
= control target key start
LH: loop header
LB: loop body
LE: loop exit
PB: predicated region body
PF: predicated region fallthrough
CT: control target
= control target key end

     0   :  { %15 = vsyncpa [#allocation3], 0  ;;  %s703_s0 = inlined_call_operand.hbm [shape: f32[2,4], index: 0, kind: input, shape index: {}]   ;;  %s704_s1 = inlined_call_operand.hbm [shape: f32[2,4], index: 1, kind: input, shape index: {}]   ;;  %s705_s2 = inlined_call_operand.hbm [shape: f32[2,3], index: 2, kind: input, shape index: {}]   ;;  %s706_s3 = inlined_call_operand.hbm [shape: f32[2,384], index: 3, kind: input, shape index: {}]   ;;  %s707_s4 = inlined_call_operand.hbm [shape: f32[2,384], index: 4, kind: input, shape index: {}]   ;;  %s708_s5 = inlined_call_operand.hbm [shape: f32[2,384], index: 5, kind: input, shape index: {}]   ;;  %s709_s6 = inlined_call_operand.hbm [shape: f32[2,384], index: 6, kind: input, shape index: {}]   ;;  %s710_s7 = inlined_call_operand.hbm [shape: f32[2,384], index: 7, kind: output, shape index: {0}]   ;;  %s711_s8 = inlined_call_operand.hbm [shape: f32[2,384], index: 8, kind: output, shape index: {1}]   ;;  %s712_s9 = inlined_call_operand.hbm [shape: f32[2,384], index: 9, kind: output, shape index: {2}]  }
   0x1   :  { %16 = vsyncpa [#allocation6], 0 }
   0x2   :  { %17 = vsyncpa [#allocation9], 0 }
   0x3   :  { %18 = vsyncpa [#allocation12], 0 }
   0x4   :  { %19 = vsyncpa [#allocation4], 0  ;;  %s37_s11 = sshll.u32 %s704_s1, 4  ;;  %s38_s11 = int_to_ptr.hbm [resolvable:$true] %s37_s11 }
   0x5   :  { %20 = vsyncpa [#allocation16], 0  ;;  %s591_s12 = smov [#allocation5]   ;;  %s59_s16 = sshll.u32 %s706_s3, 4  ;;  %s60_s16 = int_to_ptr.hbm [resolvable:$true] %s59_s16 }
   0x6   :  { %s39_s13 = sshll.u32 %s591_s12, 4  ;;  %s592_s17 = smov [#allocation8]   ;;  %s40_s13 = int_to_ptr.vmem [resolvable:$true] %s39_s13 }
   0x7   :  { %42 = dma.hbm_to_vmem [thread:$0]  %s38_s11, 32, %s40_s13, [#allocation6]  }
   0x8   :  { %s61_s18 = sshll.u32 %s592_s17, 4  ;;  %s81_s21 = sshll.u32 %s708_s5, 4  ;;  %s62_s18 = int_to_ptr.vmem [resolvable:$true] %s61_s18  ;;  %s82_s21 = int_to_ptr.hbm [resolvable:$true] %s81_s21 }
   0x9   :  { %64 = dma.hbm_to_vmem [thread:$0]  %s60_s16, 96, %s62_s18, [#allocation9]  }
   0xa   :  { %s26_s23 = sshll.u32 %s703_s0, 4  ;;  %s593_s24 = smov [#allocation11]   ;;  %s27_s23 = int_to_ptr.hbm [resolvable:$true] %s26_s23 }
   0xb   :  { %s83_s25 = sshll.u32 %s593_s24, 4  ;;  %s594_s3 = smov [#allocation2]   ;;  %s84_s25 = int_to_ptr.vmem [resolvable:$true] %s83_s25 }
   0xc   :  { %86 = dma.hbm_to_vmem [thread:$0]  %s82_s21, 96, %s84_s25, [#allocation12]  }
   0xd   :  { %s28_s26 = sshll.u32 %s594_s3, 4  ;;  %s48_s29 = sshll.u32 %s705_s2, 4  ;;  %s29_s26 = int_to_ptr.vmem [resolvable:$true] %s28_s26  ;;  %s49_s29 = int_to_ptr.hbm [resolvable:$true] %s48_s29 }
   0xe   :  { %31 = dma.hbm_to_vmem [thread:$0]  %s27_s23, 32, %s29_s26, [#allocation3]  }
   0xf   :  { %s70_s10 = sshll.u32 %s707_s4, 4  ;;  %s595_s11 = smov [#allocation7]   ;;  %s71_s10 = int_to_ptr.hbm [resolvable:$true] %s70_s10 }
  0x10   :  { %s50_s0 = sshll.u32 %s595_s11, 4  ;;  %s596_s12 = smov [#allocation10]   ;;  %s51_s0 = int_to_ptr.vmem [resolvable:$true] %s50_s0 }
  0x11   :  { %53 = dma.hbm_to_vmem [thread:$0]  %s49_s29, 32, %s51_s0, [#allocation6]  }
  0x12   :  { %s72_s13 = sshll.u32 %s596_s12, 4  ;;  %s92_s16 = sshll.u32 %s709_s6, 4  ;;  %s73_s13 = int_to_ptr.vmem [resolvable:$true] %s72_s13  ;;  %s93_s16 = int_to_ptr.hbm [resolvable:$true] %s92_s16 }
  0x13   :  { %75 = dma.hbm_to_vmem [thread:$0]  %s71_s10, 96, %s73_s13, [#allocation9]  }
  0x14   :  { %s597_s2 = smov [#allocation13]  }
  0x15   :  { %s94_s17 = sshll.u32 %s597_s2, 4  ;;  %s95_s17 = int_to_ptr.vmem [resolvable:$true] %s94_s17 }
  0x16   :  { %97 = dma.hbm_to_vmem [thread:$0]  %s93_s16, 96, %s95_s17, [#allocation12]  }
  0x17   :  { %579 = dma.done.wait [#allocation3], 32  }
  0x18   :  { %580 = vsyncadd [#allocation3], 4294967264 }
  0x19   :  { %581 = dma.done.wait [#allocation6], 64  }
  0x1a   :  { %582 = vsyncadd [#allocation6], 4294967232 }
  0x1b   :  { %583 = dma.done.wait [#allocation9], 192  }
  0x1c   :  { %584 = vsyncadd [#allocation9], 4294967104 }
  0x1d   :  { %585 = dma.done.wait [#allocation12], 192  }
  0x1e   :  { %586 = vsyncadd [#allocation12], 4294967104  ;;  %v598_v0 = vmov 2   ;;  %v599_v1 = vmov 1   ;;  %v600_v2 = vmov 3   ;;  %v601_v5 = vmov 0  }
  0x1f   :  { %332 = vset.pattern.permute.xlu1 %v598_v0  ;;  %331 = vset.pattern.permute.xlu0 %v599_v1  ;;  %v126_v3 = vld [vmem:[#allocation2] sm:$0x3]  ;;  %v127_v4 = vld [vmem:[#allocation5] sm:$0x3]  ;;  %v128_v6 = vld [vmem:[#allocation7] sm:$0x3] }
  0x20   :  { %333 = vset.pattern.permute.xlu2 %v600_v2  ;;  %168 = vperm.xlu1 %332, %v126_v3   ;;  %v602_v8 = vmov 269488144   ;;  %v129_v14 = vld [vmem:[#allocation13] sm:$0x3f]  ;;  %v201_v17 = vld [vmem:[#allocation8] sm:$0x3f] }
  0x21   :  { %151 = vperm.xlu0 %331, %v126_v3   ;;  %185 = vperm.xlu2 %333, %v126_v3   ;;  %v140_v9 = vunpack.c.l.s4 %v602_v8  ;;  %vm130_vm0 = vcmp.gt.f32.partialorder %v129_v14, 0.5  ;;  %v202_v21 = vld [vmem:[#allocation10] sm:$0x3f]  ;;  %v203_v26 = vld [vmem:[#allocation11] sm:$0x3f]  ;;  %s603_s4 = smov [#allocation15]  }
  0x22   :  { %s281_s6 = sshll.u32 %s603_s4, 4  ;;  %s283_s20 = sshll.u32 %s711_s8, 4  ;;  %s282_s6 = int_to_ptr.vmem [resolvable:$true] %s281_s6  ;;  %s284_s20 = int_to_ptr.hbm [resolvable:$true] %s283_s20 }
  0x23   :  { %v677_v10 = vunpack.c.0.s8 %v140_v9  ;;  %s604_s21 = smov [#allocation14]   ;;  %s272_s24 = sshll.u32 %s710_s7, 4  ;;  %s273_s24 = int_to_ptr.hbm [resolvable:$true] %s272_s24 }
  0x24   :  { %s270_s1 = sshll.u32 %s604_s21, 4  ;;  %s605_s25 = smov [#allocation17]   ;;  %s271_s1 = int_to_ptr.vmem [resolvable:$true] %s270_s1 }
  0x25   :  { %s292_s3 = sshll.u32 %s605_s25, 4  ;;  %s294_s28 = sshll.u32 %s712_s9, 4  ;;  %s293_s3 = int_to_ptr.vmem [resolvable:$true] %s292_s3  ;;  %s295_s28 = int_to_ptr.hbm [resolvable:$true] %s294_s28 }
  0x28   :  { %171 = vperm.xlu1 %332, %v127_v4  }
  0x29   :  { %154 = vperm.xlu0 %331, %v127_v4   ;;  %188 = vperm.xlu2 %333, %v127_v4  }
  0x30   :  { %335 = vset.pattern.permute.xlu1 %v601_v5 }
  0x31   :  { %334 = vset.pattern.permute.xlu0 %v601_v5  ;;  %137 = vperm.xlu1 %335, %v127_v4  }
  0x32   :  { %133 = vperm.xlu0 %334, %v126_v3   ;;  %336 = vset.pattern.permute.xlu2 %v599_v1 }
  0x33   :  { %242 = vperm.xlu2 %336, %v128_v6  }
  0x39   :  { %228 = vperm.xlu1 %335, %v128_v6  }
  0x3a   :  { %338 = vset.pattern.permute.xlu0 %v598_v0 }
  0x3b   :  { %337 = vset.pattern.permute.xlu2 %v598_v0 }
  0x3c   :  { %256 = vperm.xlu2 %337, %v128_v6  }
  0x7b   :  { %v186_v7 = vpop.permute.xlu2 %185 }
  0x7c   :  { %v193_v15 = vperm.slane %v186_v7, %v677_v10 }
  0x83   :  { %v189_v13 = vpop.permute.xlu2 %188 }
  0x84   :  { %v198_v16 = vperm.slane %v189_v13, %v677_v10 }
  0x86   :  { %v200_v18 = vsel %vm130_vm0, %v193_v15, %v198_v16 }
  0x87   :  { %v207_v27 = vmul.f32 %v201_v17, %v200_v18  ;;  %v205_v30 = vmul.f32 %v202_v21, %v200_v18 }
  0x8d   :  { %v243_v32 = vpop.permute.xlu2 %242 }
  0x8e   :  { %v247_v3 = vperm.slane %v243_v32, %v677_v10 }
  0x92   :  { %v169_v11 = vpop.permute.xlu1 %168 }
  0x93   :  { %v152_v12 = vpop.permute.xlu0 %151  ;;  %v176_v22 = vperm.slane %v169_v11, %v677_v10 }
  0x94   :  { %v159_v23 = vperm.slane %v152_v12, %v677_v10 }
  0x96   :  { %v257_v56 = vpop.permute.xlu2 %256 }
  0x97   :  { %v261_v0 = vperm.slane %v257_v56, %v677_v10 }
  0x9a   :  { %v172_v19 = vpop.permute.xlu1 %171 }
  0x9b   :  { %v155_v20 = vpop.permute.xlu0 %154  ;;  %v181_v24 = vperm.slane %v172_v19, %v677_v10 }
  0x9c   :  { %v164_v25 = vperm.slane %v155_v20, %v677_v10 }
  0x9d   :  { %v183_v28 = vsel %vm130_vm0, %v176_v22, %v181_v24 }
  0x9e   :  { %v166_v29 = vsel %vm130_vm0, %v159_v23, %v164_v25  ;;  %v211_v31 = vmul.f32 %v201_v17, %v183_v28  ;;  %v204_v33 = vmul.f32 %v203_v26, %v183_v28 }
  0x9f   :  { %v208_v34 = vmul.f32 %v203_v26, %v166_v29  ;;  %v210_v35 = vmul.f32 %v202_v21, %v166_v29 }
  0xa0   :  { %v206_v36 = vsub.f32 %v204_v33, %v205_v30 }
  0xa1   :  { %v209_v37 = vsub.f32 %v207_v27, %v208_v34  ;;  %v212_v38 = vsub.f32 %v210_v35, %v211_v31 }
  0xa2   :  { %v216_v39 = vmul.f32 %v206_v36, %v200_v18  ;;  %v220_v46 = vmul.f32 %v206_v36, %v183_v28 }
  0xa3   :  { %v217_v40 = vmul.f32 %v212_v38, %v166_v29  ;;  %v213_v41 = vmul.f32 %v212_v38, %v183_v28  ;;  %v214_v42 = vmul.f32 %v209_v37, %v200_v18  ;;  %v138_v43 = vpop.permute.xlu1 %137  ;;  %v219_v45 = vmul.f32 %v209_v37, %v166_v29 }
  0xa4   :  { %v134_v44 = vpop.permute.xlu0 %133  ;;  %v147_v47 = vperm.slane %v138_v43, %v677_v10 }
  0xa5   :  { %v142_v48 = vperm.slane %v134_v44, %v677_v10  ;;  %v218_v50 = vsub.f32 %v216_v39, %v217_v40  ;;  %v215_v51 = vsub.f32 %v213_v41, %v214_v42  ;;  %v221_v54 = vsub.f32 %v219_v45, %v220_v46 }
  0xa7   :  { %v149_v49 = vsel %vm130_vm0, %v142_v48, %v147_v47 }
  0xa8   :  { %v237_v52 = vmul.f32 %v209_v37, %v149_v49  ;;  %v222_v53 = vmul.f32 %v206_v36, %v149_v49  ;;  %v251_v55 = vmul.f32 %v212_v38, %v149_v49 }
  0xaa   :  { %v238_v57 = vadd.f32 %v237_v52, %v218_v50  ;;  %v223_v58 = vadd.f32 %v222_v53, %v215_v51  ;;  %v252_v59 = vadd.f32 %v251_v55, %v221_v54 }
  0xab   :  { %v229_v61 = vpop.permute.xlu1 %228 }
  0xac   :  { %v239_v60 = vmul.f32 2.0, %v238_v57  ;;  %v224_v62 = vmul.f32 2.0, %v223_v58  ;;  %v253_v63 = vmul.f32 2.0, %v252_v59  ;;  %v233_v1 = vperm.slane %v229_v61, %v677_v10 }
  0xae   :  { %v240_v2 = vadd.f32 %v239_v60, %v202_v21  ;;  %v225_v4 = vadd.f32 %v224_v62, %v201_v17  ;;  %v254_v5 = vadd.f32 %v253_v63, %v203_v26 }
  0xb0   :  { %v249_v6 = vadd.f32 %v247_v3, %v240_v2  ;;  %v235_v7 = vadd.f32 %v233_v1, %v225_v4  ;;  %v263_v8 = vadd.f32 %v261_v0, %v254_v5 }
  0xb2   :  { %250 = vst [vmem:[#allocation15] sm:$0x3f] %v249_v6 }
  0xb3   :  { %236 = vst [vmem:[#allocation14] sm:$0x3f] %v235_v7  ;;  %286 = dma.vmem_to_hbm [thread:$0]  %s282_s6, 96, %s284_s20, [#allocation16]  }
  0xb4   :  { %264 = vst [vmem:[#allocation17] sm:$0x3f] %v263_v8  ;;  %275 = dma.vmem_to_hbm [thread:$0]  %s271_s1, 96, %s273_s24, [#allocation4]  }
  0xb5   :  { %297 = dma.vmem_to_hbm [thread:$0]  %s293_s3, 96, %s295_s28, [#allocation16]  }
  0xb6   :  { %587 = dma.done.wait [#allocation4], 96  }
  0xb7   :  { %588 = vsyncadd [#allocation4], 4294967200 }
  0xb8   :  { %589 = dma.done.wait [#allocation16], 192  }
  0xb9   :  { %590 = vsyncadd [#allocation16], 4294967104 }
  0xba   :  { %310 = vsyncpa [#allocation3], 1 }
  0xbb   :  { %311 = vsyncpa [#allocation6], 1 }
  0xbc   :  { %312 = vsyncpa [#allocation9], 1 }
  0xbd   :  { %313 = vsyncpa [#allocation12], 1 }
  0xbe   :  { %314 = vsyncpa [#allocation4], 1 }
  0xbf   :  { %315 = vsyncpa [#allocation16], 1 }

</bundles_post_ra>
